<compile_context>
chip_gen: v7x
topology: tpu7x:2x2x1
jax: 0.10.0
libtpu: 0.0.40
codegen_flags: <defaults>
</compile_context>

<pallas_src>
import functools

import jax
import jax.numpy as jnp
from jax.experimental import pallas as pl
from jax.experimental.pallas import tpu as pltpu


# ---------------------------------------------------------------------------
# helpers
# ---------------------------------------------------------------------------
def _round_up(x: int, m: int) -> int:
    return (x + m - 1) // m * m


def _pick_vmem_limit_bytes() -> int:
    """Per-generation scoped VMEM limit with headroom for compiler scratch."""
    cap = 128 * 1024 * 1024  # v5e/v6e physical; safe fallback
    try:
        info = pltpu.get_tpu_info()
        cap = int(getattr(info, "vmem_capacity_bytes", cap))
    except Exception:
        pass
    # 128 MiB phys -> 100 MiB limit; 64 MiB phys (v7x) -> 48 MiB limit
    return int(min(max(cap - 16 * 1024 * 1024, 32 * 1024 * 1024),
                   100 * 1024 * 1024))


_VMEM_LIMIT_BYTES = _pick_vmem_limit_bytes()


# ---------------------------------------------------------------------------
# fused MLP kernel: x (BM, IN_p) -> o (BM, OUT_p); all layers chained in VMEM
# ---------------------------------------------------------------------------
def _fused_mlp_kernel(*refs, num_linear: int):
    # refs = (x_ref, w0, b0, w1, b1, ..., w_{L-1}, b_{L-1}, o_ref)
    x_ref = refs[0]
    o_ref = refs[1 + 2 * num_linear]

    h = x_ref[...]                                 # compute dtype (f32 or bf16)
    for i in range(num_linear):
        w = refs[1 + 2 * i][...]                   # (IN_p, OUT_p), compute dtype
        b = refs[2 + 2 * i][...]                   # (1, OUT_p), f32
        acc = jnp.dot(h, w, preferred_element_type=jnp.float32) + b   # f32 acc
        if i < num_linear - 1:
            acc = jnp.maximum(acc, 0.0)            # ReLU on all but the last layer
            h = acc.astype(w.dtype)                # back to compute dtype for next MXU op
        else:
            h = acc
    o_ref[...] = h.astype(o_ref.dtype)


# ---------------------------------------------------------------------------
# parameter init (mirrors PyTorch nn.Linear default init, [out, in] layout)
# ---------------------------------------------------------------------------
def init_mlp_params(key, input_size, hidden_size, num_layers, output_size,
                    dtype=jnp.float32):
    dims = [input_size] + [hidden_size] * num_layers + [output_size]
    params = []
    for i in range(len(dims) - 1):
        fan_in, fan_out = dims[i], dims[i + 1]
        key, kw, kb = jax.random.split(key, 3)
        bound = 1.0 / (fan_in ** 0.5)
        w = jax.random.uniform(kw, (fan_out, fan_in), dtype, -bound, bound)
        b = jax.random.uniform(kb, (fan_out,), dtype, -bound, bound)
        params.append((w, b))
    return params


def prepare_params(params, compute_dtype=jnp.float32, lane_align=128):
    """One-time prep: transpose to [in, out] and zero-pad feature dims.

    compute_dtype=jnp.bfloat16 recommended on v6e/v7x (f32 accumulation stays
    inside the kernel). lane_align=256 fills the 2x256^2 MXU on v6e/v7x; 128 is
    optimal on v5e (4x128^2 MXU). Zero padding is exact.
    """
    prepped = []
    for w, b in params:
        out_f, in_f = w.shape
        in_p = _round_up(in_f, lane_align)
        out_p = _round_up(out_f, lane_align)
        w_t = jnp.zeros((in_p, out_p), compute_dtype)
        w_t = w_t.at[:in_f, :out_f].set(jnp.transpose(w).astype(compute_dtype))
        b_p = jnp.zeros((1, out_p), jnp.float32)            # f32 bias: added to f32 acc
        b_p = b_p.at[0, :out_f].set(b.astype(jnp.float32))
        prepped.append((w_t, b_p))
    return prepped


# ---------------------------------------------------------------------------
# forward pass: single fused pallas_call, batch-tiled grid
# ---------------------------------------------------------------------------
def simple_mlp_forward(x, prepped_params, *, output_size: int, block_m: int = 256,
                       compute_dtype=jnp.float32):
    batch, in_f = x.shape
    num_linear = len(prepped_params)
    in_p = prepped_params[0][0].shape[0]
    out_p = prepped_params[-1][0].shape[1]

    # batch tile: multiple of 8 (f32) / 16 (bf16) sublanes, capped at block_m
    sub = 16 if compute_dtype == jnp.bfloat16 else 8
    bm = min(block_m, _round_up(batch, sub))
    # guarantee >= 2 grid steps when the batch allows it, so the "parallel"
    # batch axis actually shards across v7x's two TensorCores
    if _round_up(batch, sub) <= bm and batch >= 2 * sub:
        bm = _round_up((batch + 1) // 2, sub)
    batch_p = _round_up(batch, bm)

    # resident-weight VMEM sanity check (single-buffered weights + f32 biases)
    weight_bytes = sum(w.size * w.dtype.itemsize + b.size * b.dtype.itemsize
                       for w, b in prepped_params)
    # TODO(synk): switch to a K/N-tiled accumulator path instead of asserting
    #             when resident weights exceed the VMEM budget (large hidden on v7x).
    assert weight_bytes < _VMEM_LIMIT_BYTES, "weights exceed VMEM; need tiled path"

    # pad input (exact: padded features hit zero weight rows); skip when aligned
    x_c = x.astype(compute_dtype)
    if batch_p != batch or in_p != in_f:
        x_c = jnp.pad(x_c, ((0, batch_p - batch), (0, in_p - in_f)))

    flat_inputs = [x_c]
    in_specs = [pl.BlockSpec((bm, in_p), lambda i: (i, 0))]
    for w_t, b_p in prepped_params:
        flat_inputs.append(w_t)
        flat_inputs.append(b_p)
        # grid-invariant blocks: single-buffer them (index_map is constant)
        in_specs.append(pl.BlockSpec(w_t.shape, lambda i: (0, 0),
                                     pipeline_mode=pl.Buffered(1)))
        in_specs.append(pl.BlockSpec(b_p.shape, lambda i: (0, 0),
                                     pipeline_mode=pl.Buffered(1)))

    kernel = functools.partial(_fused_mlp_kernel, num_linear=num_linear)

    flops = 2 * batch_p * sum(w.shape[0] * w.shape[1] for w, _ in prepped_params)
    bytes_accessed = (weight_bytes + x_c.size * x_c.dtype.itemsize
                      + batch_p * out_p * jnp.dtype(x.dtype).itemsize)

    out_arr = pl.pallas_call(
        kernel,
        out_shape=jax.ShapeDtypeStruct((batch_p, out_p), x.dtype),
        grid=(batch_p // bm,),
        in_specs=in_specs,
        out_specs=pl.BlockSpec((bm, out_p), lambda i: (i, 0)),
        compiler_params=pltpu.CompilerParams(
            dimension_semantics=("parallel",),       # shard batch tiles across TCs
            vmem_limit_bytes=_VMEM_LIMIT_BYTES,      # per-generation limit
        ),
        cost_estimate=pl.CostEstimate(flops=flops, transcendentals=0,
                                      bytes_accessed=bytes_accessed),
    )(*flat_inputs)

    # strip batch / feature padding
    return out_arr[:batch, :output_size]


# ---------------------------------------------------------------------------
# pure-JAX reference (PyTorch semantics)
# ---------------------------------------------------------------------------
def simple_mlp_reference(x, params):
    n = len(params)
    h = x
    for i, (w, b) in enumerate(params):
        h = h @ w.T + b
        if i < n - 1:
            h = jnp.maximum(h, 0.0)
    return h


if __name__ == "__main__":
    # Small shapes consistent with SimpleMLP
    batch = 8
    input_size = 32
    hidden_size = 64
    num_layers = 3
    output_size = 16

    key = jax.random.PRNGKey(0)
    kx, kp = jax.random.split(key)
    x = jax.random.normal(kx, (batch, input_size), jnp.float32)
    params = init_mlp_params(kp, input_size, hidden_size, num_layers, output_size)

    # one-time parameter prep (transpose + pad); f32 compute to match module
    # semantics (use compute_dtype=jnp.bfloat16 / lane_align=256 on v6e/v7x).
    prepped = prepare_params(params, compute_dtype=jnp.float32, lane_align=128)

    fwd = jax.jit(functools.partial(simple_mlp_forward, output_size=output_size))
    out = fwd(x, prepped)
    out = jax.block_until_ready(out)

    ref = simple_mlp_reference(x, params)
    assert out.shape == (batch, output_size)
    # tolerance accounts for TPU default matmul precision on the f32 path
    assert jnp.allclose(out, ref, atol=1e-3, rtol=1e-3), "mismatch vs reference"

    print("KERNEL_OK")
</pallas_src>

<mosaic_0001>
module attributes {stable_mosaic.version = 11 : i64} {
  func.func @_fused_mlp_kernel(%arg0: i32, %arg1: memref<8x128xf32, #tpu.memory_space<vmem>>, %arg2: memref<128x128xf32, #tpu.memory_space<vmem>>, %arg3: memref<1x128xf32, #tpu.memory_space<vmem>>, %arg4: memref<128x128xf32, #tpu.memory_space<vmem>>, %arg5: memref<1x128xf32, #tpu.memory_space<vmem>>, %arg6: memref<128x128xf32, #tpu.memory_space<vmem>>, %arg7: memref<1x128xf32, #tpu.memory_space<vmem>>, %arg8: memref<128x128xf32, #tpu.memory_space<vmem>>, %arg9: memref<1x128xf32, #tpu.memory_space<vmem>>, %arg10: memref<8x128xf32, #tpu.memory_space<vmem>>) attributes {dimension_semantics = [#tpu.dimension_semantics<parallel>], iteration_bounds = array<i64: 1>, scalar_prefetch = 0 : i64, scratch_operands = 0 : i64, tpu.core_type = #tpu.core_type<tc>, window_params = [{transform_indices = @transform_0, window_bounds = array<i64: 8, 128>}, {pipeline_mode = #tpu.pipeline_mode<synchronous>, transform_indices = @transform_1, window_bounds = array<i64: 128, 128>}, {pipeline_mode = #tpu.pipeline_mode<synchronous>, transform_indices = @transform_2, window_bounds = array<i64: 1, 128>}, {pipeline_mode = #tpu.pipeline_mode<synchronous>, transform_indices = @transform_3, window_bounds = array<i64: 128, 128>}, {pipeline_mode = #tpu.pipeline_mode<synchronous>, transform_indices = @transform_4, window_bounds = array<i64: 1, 128>}, {pipeline_mode = #tpu.pipeline_mode<synchronous>, transform_indices = @transform_5, window_bounds = array<i64: 128, 128>}, {pipeline_mode = #tpu.pipeline_mode<synchronous>, transform_indices = @transform_6, window_bounds = array<i64: 1, 128>}, {pipeline_mode = #tpu.pipeline_mode<synchronous>, transform_indices = @transform_7, window_bounds = array<i64: 128, 128>}, {pipeline_mode = #tpu.pipeline_mode<synchronous>, transform_indices = @transform_8, window_bounds = array<i64: 1, 128>}, {transform_indices = @transform_9, window_bounds = array<i64: 8, 128>}]} {
    %c0 = arith.constant 0 : index
    %c0_0 = arith.constant 0 : index
    %0 = vector.load %arg1[%c0, %c0_0] : memref<8x128xf32, #tpu.memory_space<vmem>>, vector<8x128xf32>
    %c0_1 = arith.constant 0 : index
    %c0_2 = arith.constant 0 : index
    %1 = vector.load %arg2[%c0_1, %c0_2] : memref<128x128xf32, #tpu.memory_space<vmem>>, vector<128x128xf32>
    %c0_3 = arith.constant 0 : index
    %c0_4 = arith.constant 0 : index
    %2 = vector.load %arg3[%c0_3, %c0_4] : memref<1x128xf32, #tpu.memory_space<vmem>>, vector<1x128xf32>
    %cst = arith.constant dense<0.000000e+00> : vector<8x128xf32>
    %3 = tpu.matmul %0, %1, %cst {dimension_numbers = #tpu.dot_dimension_numbers<[1], [0], [0], [1], [0, 0, 1, 1], [], []>} : vector<8x128xf32>, vector<128x128xf32>, vector<8x128xf32> -> vector<8x128xf32>
    %4 = vector.broadcast %2 : vector<1x128xf32> to vector<8x128xf32>
    %5 = arith.addf %3, %4 : vector<8x128xf32>
    %cst_5 = arith.constant 0.000000e+00 : f32
    %6 = vector.broadcast %cst_5 : f32 to vector<8x128xf32>
    %7 = arith.maximumf %5, %6 : vector<8x128xf32>
    %c0_6 = arith.constant 0 : index
    %c0_7 = arith.constant 0 : index
    %8 = vector.load %arg4[%c0_6, %c0_7] : memref<128x128xf32, #tpu.memory_space<vmem>>, vector<128x128xf32>
    %c0_8 = arith.constant 0 : index
    %c0_9 = arith.constant 0 : index
    %9 = vector.load %arg5[%c0_8, %c0_9] : memref<1x128xf32, #tpu.memory_space<vmem>>, vector<1x128xf32>
    %cst_10 = arith.constant dense<0.000000e+00> : vector<8x128xf32>
    %10 = tpu.matmul %7, %8, %cst_10 {dimension_numbers = #tpu.dot_dimension_numbers<[1], [0], [0], [1], [0, 0, 1, 1], [], []>} : vector<8x128xf32>, vector<128x128xf32>, vector<8x128xf32> -> vector<8x128xf32>
    %11 = vector.broadcast %9 : vector<1x128xf32> to vector<8x128xf32>
    %12 = arith.addf %10, %11 : vector<8x128xf32>
    %cst_11 = arith.constant 0.000000e+00 : f32
    %13 = vector.broadcast %cst_11 : f32 to vector<8x128xf32>
    %14 = arith.maximumf %12, %13 : vector<8x128xf32>
    %c0_12 = arith.constant 0 : index
    %c0_13 = arith.constant 0 : index
    %15 = vector.load %arg6[%c0_12, %c0_13] : memref<128x128xf32, #tpu.memory_space<vmem>>, vector<128x128xf32>
    %c0_14 = arith.constant 0 : index
    %c0_15 = arith.constant 0 : index
    %16 = vector.load %arg7[%c0_14, %c0_15] : memref<1x128xf32, #tpu.memory_space<vmem>>, vector<1x128xf32>
    %cst_16 = arith.constant dense<0.000000e+00> : vector<8x128xf32>
    %17 = tpu.matmul %14, %15, %cst_16 {dimension_numbers = #tpu.dot_dimension_numbers<[1], [0], [0], [1], [0, 0, 1, 1], [], []>} : vector<8x128xf32>, vector<128x128xf32>, vector<8x128xf32> -> vector<8x128xf32>
    %18 = vector.broadcast %16 : vector<1x128xf32> to vector<8x128xf32>
    %19 = arith.addf %17, %18 : vector<8x128xf32>
    %cst_17 = arith.constant 0.000000e+00 : f32
    %20 = vector.broadcast %cst_17 : f32 to vector<8x128xf32>
    %21 = arith.maximumf %19, %20 : vector<8x128xf32>
    %c0_18 = arith.constant 0 : index
    %c0_19 = arith.constant 0 : index
    %22 = vector.load %arg8[%c0_18, %c0_19] : memref<128x128xf32, #tpu.memory_space<vmem>>, vector<128x128xf32>
    %c0_20 = arith.constant 0 : index
    %c0_21 = arith.constant 0 : index
    %23 = vector.load %arg9[%c0_20, %c0_21] : memref<1x128xf32, #tpu.memory_space<vmem>>, vector<1x128xf32>
    %cst_22 = arith.constant dense<0.000000e+00> : vector<8x128xf32>
    %24 = tpu.matmul %21, %22, %cst_22 {dimension_numbers = #tpu.dot_dimension_numbers<[1], [0], [0], [1], [0, 0, 1, 1], [], []>} : vector<8x128xf32>, vector<128x128xf32>, vector<8x128xf32> -> vector<8x128xf32>
    %25 = vector.broadcast %23 : vector<1x128xf32> to vector<8x128xf32>
    %26 = arith.addf %24, %25 : vector<8x128xf32>
    %c0_23 = arith.constant 0 : index
    %c0_24 = arith.constant 0 : index
    %27 = vector.load %arg10[%c0_23, %c0_24] : memref<8x128xf32, #tpu.memory_space<vmem>>, vector<8x128xf32>
    tpu.vector_store %arg10[%c0_23, %c0_24], %26 {strides = array<i32>} : memref<8x128xf32, #tpu.memory_space<vmem>>, vector<8x128xf32>,
    return
  }
  func.func @transform_0(%arg0: i32) -> (i32, i32) {
    %c0_i32 = arith.constant 0 : i32
    %c0_i32_0 = arith.constant 0 : i32
    return %arg0, %c0_i32 : i32, i32
  }
  func.func @transform_1(%arg0: i32) -> (i32, i32) {
    %c0_i32 = arith.constant 0 : i32
    %c0_i32_0 = arith.constant 0 : i32
    %c0_i32_1 = arith.constant 0 : i32
    return %c0_i32, %c0_i32_0 : i32, i32
  }
  func.func @transform_2(%arg0: i32) -> (i32, i32) {
    %c0_i32 = arith.constant 0 : i32
    %c0_i32_0 = arith.constant 0 : i32
    %c0_i32_1 = arith.constant 0 : i32
    return %c0_i32, %c0_i32_0 : i32, i32
  }
  func.func @transform_3(%arg0: i32) -> (i32, i32) {
    %c0_i32 = arith.constant 0 : i32
    %c0_i32_0 = arith.constant 0 : i32
    %c0_i32_1 = arith.constant 0 : i32
    return %c0_i32, %c0_i32_0 : i32, i32
  }
  func.func @transform_4(%arg0: i32) -> (i32, i32) {
    %c0_i32 = arith.constant 0 : i32
    %c0_i32_0 = arith.constant 0 : i32
    %c0_i32_1 = arith.constant 0 : i32
    return %c0_i32, %c0_i32_0 : i32, i32
  }
  func.func @transform_5(%arg0: i32) -> (i32, i32) {
    %c0_i32 = arith.constant 0 : i32
    %c0_i32_0 = arith.constant 0 : i32
    %c0_i32_1 = arith.constant 0 : i32
    return %c0_i32, %c0_i32_0 : i32, i32
  }
  func.func @transform_6(%arg0: i32) -> (i32, i32) {
    %c0_i32 = arith.constant 0 : i32
    %c0_i32_0 = arith.constant 0 : i32
    %c0_i32_1 = arith.constant 0 : i32
    return %c0_i32, %c0_i32_0 : i32, i32
  }
  func.func @transform_7(%arg0: i32) -> (i32, i32) {
    %c0_i32 = arith.constant 0 : i32
    %c0_i32_0 = arith.constant 0 : i32
    %c0_i32_1 = arith.constant 0 : i32
    return %c0_i32, %c0_i32_0 : i32, i32
  }
  func.func @transform_8(%arg0: i32) -> (i32, i32) {
    %c0_i32 = arith.constant 0 : i32
    %c0_i32_0 = arith.constant 0 : i32
    %c0_i32_1 = arith.constant 0 : i32
    return %c0_i32, %c0_i32_0 : i32, i32
  }
  func.func @transform_9(%arg0: i32) -> (i32, i32) {
    %c0_i32 = arith.constant 0 : i32
    %c0_i32_0 = arith.constant 0 : i32
    return %arg0, %c0_i32 : i32, i32
  }
}

</mosaic_0001>

<bundles_post_ra>
// kernel: simple_mlp_forward.1
= control target key start
LH: loop header
LB: loop body
LE: loop exit
PB: predicated region body
PF: predicated region fallthrough
CT: control target
= control target key end

     0   :  { %14 = vsyncpa [#allocation3], 0  ;;  %s1333_s0 = inlined_call_operand.hbm [shape: f32[8,128], index: 0, kind: input, shape index: {}]   ;;  %s1334_s1 = inlined_call_operand.hbm [shape: f32[128,128], index: 1, kind: input, shape index: {}]   ;;  %s1335_s2 = inlined_call_operand.hbm [shape: f32[1,128], index: 2, kind: input, shape index: {}]   ;;  %s1336_s3 = inlined_call_operand.hbm [shape: f32[128,128], index: 3, kind: input, shape index: {}]   ;;  %s1337_s4 = inlined_call_operand.hbm [shape: f32[1,128], index: 4, kind: input, shape index: {}]   ;;  %s1338_s5 = inlined_call_operand.hbm [shape: f32[128,128], index: 5, kind: input, shape index: {}]   ;;  %s1339_s6 = inlined_call_operand.hbm [shape: f32[1,128], index: 6, kind: input, shape index: {}]   ;;  %s1340_s7 = inlined_call_operand.hbm [shape: f32[128,128], index: 7, kind: input, shape index: {}]   ;;  %s1341_s8 = inlined_call_operand.hbm [shape: f32[1,128], index: 8, kind: input, shape index: {}]   ;;  %s1342_s9 = inlined_call_operand.hbm [shape: f32[8,128], index: 9, kind: output, shape index: {}]  }
   0x1   :  { %15 = vsyncpa [#allocation6], 0 }
   0x2   :  { %16 = vsyncpa [#allocation9], 0 }
   0x3   :  { %17 = vsyncpa [#allocation12], 0 }
   0x4   :  { %18 = vsyncpa [#allocation15], 0 }
   0x5   :  { %19 = vsyncpa [#allocation4], 0  ;;  %s1096_s30 = smov [#allocation5]   ;;  %s864_s13 = scalar_lea.hbm %s1334_s1, 2048 }
   0x6   :  { %s35_s10 = sshll.u32 %s1096_s30, 4  ;;  %p865_p0 = scmp.ne.s32.totalorder %s1334_s1, %s864_s13  ;;  %s36_s10 = int_to_ptr.vmem [resolvable:$true] %s35_s10 }
   0x7   :  { %p868_p1 = scmp.lt.u32.totalorder %s864_s13, %s1334_s1 }
   0x9   :  { %p870_p2 = pnand %p868_p1, %p865_p0 }
   0xb   :  { %873 = shalt.err (!%p870_p2)
}
   0xc   :  { %s874_s18 = scalar_lea.vmem %s36_s10, 2048  ;;  %p879_p4 = scmp.lt.s32.totalorder %s36_s10, %s36_s10 }
   0xd   :  { %p875_p3 = scmp.ne.s32.totalorder %s36_s10, %s874_s18  ;;  %p880_p5 = scmp.lt.s32.totalorder %s874_s18, %s874_s18 }
   0xf   :  { %p881_p6 = por %p880_p5, %p879_p4 }
  0x11   :  { %p882_p7 = pnand %p881_p6, %p875_p3 }
  0x13   :  { %885 = shalt.err (!%p882_p7)
}
  0x14   :  { %s1097_s19 = smov 128   ;;  %s1098_s20 = smov 8  }
  0x15   :  { %41 = dma.hbm_to_vmem [thread:$0]  %s1334_s1, 2048, %s36_s10, [#allocation6], %s1097_s19, %s1097_s19, %s1098_s20  }
  0x16   :  { %s1099_s23 = smov [#allocation8]   ;;  %s1100_s25 = smov [#allocation11]  }
  0x17   :  { %s57_s24 = sshll.u32 %s1099_s23, 4  ;;  %s79_s26 = sshll.u32 %s1100_s25, 4  ;;  %s58_s24 = int_to_ptr.vmem [resolvable:$true] %s57_s24  ;;  %s80_s26 = int_to_ptr.vmem [resolvable:$true] %s79_s26 }
  0x18   :  { %s886_s29 = scalar_lea.hbm %s1336_s3, 2048 }
  0x19   :  { %p887_p8 = scmp.ne.s32.totalorder %s1336_s3, %s886_s29  ;;  %p890_p9 = scmp.lt.u32.totalorder %s886_s29, %s1336_s3 }
  0x1b   :  { %p892_p10 = pnand %p890_p9, %p887_p8 }
  0x1d   :  { %895 = shalt.err (!%p892_p10)
}
  0x1e   :  { %s896_s1 = scalar_lea.vmem %s58_s24, 2048  ;;  %p901_p12 = scmp.lt.s32.totalorder %s58_s24, %s58_s24 }
  0x1f   :  { %p897_p11 = scmp.ne.s32.totalorder %s58_s24, %s896_s1  ;;  %p902_p13 = scmp.lt.s32.totalorder %s896_s1, %s896_s1 }
  0x21   :  { %p903_p0 = por %p902_p13, %p901_p12 }
  0x23   :  { %p904_p1 = pnand %p903_p0, %p897_p11 }
  0x25   :  { %907 = shalt.err (!%p904_p1)
}
  0x26   :  { %63 = dma.hbm_to_vmem [thread:$0]  %s1336_s3, 2048, %s58_s24, [#allocation9], %s1097_s19, %s1097_s19, %s1098_s20  }
  0x27   :  { %s908_s17 = scalar_lea.hbm %s1338_s5, 2048 }
  0x28   :  { %p909_p2 = scmp.ne.s32.totalorder %s1338_s5, %s908_s17  ;;  %p912_p3 = scmp.lt.u32.totalorder %s908_s17, %s1338_s5 }
  0x2a   :  { %p914_p4 = pnand %p912_p3, %p909_p2 }
  0x2c   :  { %917 = shalt.err (!%p914_p4)
}
  0x2d   :  { %s918_s25 = scalar_lea.vmem %s80_s26, 2048  ;;  %p923_p6 = scmp.lt.s32.totalorder %s80_s26, %s80_s26 }
  0x2e   :  { %p919_p5 = scmp.ne.s32.totalorder %s80_s26, %s918_s25  ;;  %p924_p7 = scmp.lt.s32.totalorder %s918_s25, %s918_s25 }
  0x30   :  { %p925_p8 = por %p924_p7, %p923_p6 }
  0x32   :  { %p926_p9 = pnand %p925_p8, %p919_p5 }
  0x34   :  { %929 = shalt.err (!%p926_p9)
}
  0x35   :  { %85 = dma.hbm_to_vmem [thread:$0]  %s1338_s5, 2048, %s80_s26, [#allocation12], %s1097_s19, %s1097_s19, %s1098_s20  }
  0x36   :  { %s1101_s27 = smov [#allocation14]   ;;  %s1102_s29 = smov [#allocation2]  }
  0x37   :  { %s101_s28 = sshll.u32 %s1101_s27, 4  ;;  %s26_s30 = sshll.u32 %s1102_s29, 4  ;;  %s102_s28 = int_to_ptr.vmem [resolvable:$true] %s101_s28  ;;  %s27_s30 = int_to_ptr.vmem [resolvable:$true] %s26_s30 }
  0x38   :  { %s930_s13 = scalar_lea.hbm %s1340_s7, 2048 }
  0x39   :  { %p931_p10 = scmp.ne.s32.totalorder %s1340_s7, %s930_s13  ;;  %p934_p11 = scmp.lt.u32.totalorder %s930_s13, %s1340_s7 }
  0x3b   :  { %p936_p12 = pnand %p934_p11, %p931_p10 }
  0x3d   :  { %939 = shalt.err (!%p936_p12)
}
  0x3e   :  { %s940_s5 = scalar_lea.vmem %s102_s28, 2048  ;;  %p945_p0 = scmp.lt.s32.totalorder %s102_s28, %s102_s28 }
  0x3f   :  { %p941_p13 = scmp.ne.s32.totalorder %s102_s28, %s940_s5  ;;  %p946_p1 = scmp.lt.s32.totalorder %s940_s5, %s940_s5 }
  0x41   :  { %p947_p2 = por %p946_p1, %p945_p0 }
  0x43   :  { %p948_p3 = pnand %p947_p2, %p941_p13 }
  0x45   :  { %951 = shalt.err (!%p948_p3)
}
  0x46   :  { %107 = dma.hbm_to_vmem [thread:$0]  %s1340_s7, 2048, %s102_s28, [#allocation15], %s1097_s19, %s1097_s19, %s1098_s20  }
  0x47   :  { %s952_s21 = scalar_lea.hbm %s1333_s0, 128 }
  0x48   :  { %p953_p4 = scmp.ne.s32.totalorder %s1333_s0, %s952_s21  ;;  %p956_p5 = scmp.lt.u32.totalorder %s952_s21, %s1333_s0 }
  0x4a   :  { %p958_p6 = pnand %p956_p5, %p953_p4 }
  0x4c   :  { %961 = shalt.err (!%p958_p6)
}
  0x4d   :  { %s962_s24 = scalar_lea.vmem %s27_s30, 128  ;;  %p967_p8 = scmp.lt.s32.totalorder %s27_s30, %s27_s30 }
  0x4e   :  { %p963_p7 = scmp.ne.s32.totalorder %s27_s30, %s962_s24  ;;  %p968_p9 = scmp.lt.s32.totalorder %s962_s24, %s962_s24 }
  0x50   :  { %p969_p10 = por %p968_p9, %p967_p8 }
  0x52   :  { %p970_p11 = pnand %p969_p10, %p963_p7 }
  0x54   :  { %973 = shalt.err (!%p970_p11)
}
  0x55   :  { %29 = dma.hbm_to_vmem [thread:$0]  %s1333_s0, 128, %s27_s30, [#allocation3]  }
  0x56   :  { %s1103_s20 = smov [#allocation7]   ;;  %s1104_s28 = smov [#allocation10]  }
  0x57   :  { %s48_s27 = sshll.u32 %s1103_s20, 4  ;;  %s70_s29 = sshll.u32 %s1104_s28, 4  ;;  %s49_s27 = int_to_ptr.vmem [resolvable:$true] %s48_s27  ;;  %s71_s29 = int_to_ptr.vmem [resolvable:$true] %s70_s29 }
  0x58   :  { %s974_s13 = scalar_lea.hbm %s1335_s2, 16 }
  0x59   :  { %p975_p12 = scmp.ne.s32.totalorder %s1335_s2, %s974_s13  ;;  %p978_p13 = scmp.lt.u32.totalorder %s974_s13, %s1335_s2 }
  0x5b   :  { %p980_p0 = pnand %p978_p13, %p975_p12 }
  0x5d   :  { %983 = shalt.err (!%p980_p0)
}
  0x5e   :  { %s984_s0 = scalar_lea.vmem %s49_s27, 16  ;;  %s988_s30 = scalar_lea.vmem %s49_s27, 32 }
  0x5f   :  { %p985_p1 = scmp.ne.s32.totalorder %s49_s27, %s984_s0  ;;  %p989_p2 = scmp.lt.s32.totalorder %s49_s27, %s49_s27 }
  0x60   :  { %p990_p3 = scmp.lt.s32.totalorder %s988_s30, %s984_s0 }
  0x62   :  { %p991_p4 = por %p990_p3, %p989_p2 }
  0x64   :  { %p992_p5 = pnand %p991_p4, %p985_p1 }
  0x66   :  { %995 = shalt.err (!%p992_p5)
}
  0x67   :  { %51 = dma.hbm_to_vmem [thread:$0]  %s1335_s2, 16, %s49_s27, [#allocation6]  }
  0x68   :  { %s996_s18 = scalar_lea.hbm %s1337_s4, 16 }
  0x69   :  { %p997_p6 = scmp.ne.s32.totalorder %s1337_s4, %s996_s18  ;;  %p1000_p7 = scmp.lt.u32.totalorder %s996_s18, %s1337_s4 }
  0x6b   :  { %p1002_p8 = pnand %p1000_p7, %p997_p6 }
  0x6d   :  { %1005 = shalt.err (!%p1002_p8)
}
  0x6e   :  { %s1006_s3 = scalar_lea.vmem %s71_s29, 16  ;;  %s1010_s24 = scalar_lea.vmem %s71_s29, 32 }
  0x6f   :  { %p1007_p9 = scmp.ne.s32.totalorder %s71_s29, %s1006_s3  ;;  %p1011_p10 = scmp.lt.s32.totalorder %s71_s29, %s71_s29 }
  0x70   :  { %p1012_p11 = scmp.lt.s32.totalorder %s1010_s24, %s1006_s3 }
  0x72   :  { %p1013_p12 = por %p1012_p11, %p1011_p10 }
  0x74   :  { %p1014_p13 = pnand %p1013_p12, %p1007_p9 }
  0x76   :  { %1017 = shalt.err (!%p1014_p13)
}
  0x77   :  { %73 = dma.hbm_to_vmem [thread:$0]  %s1337_s4, 16, %s71_s29, [#allocation9]  }
  0x78   :  { %s1105_s19 = smov [#allocation13]   ;;  %s1106_s27 = smov [#allocation16]  }
  0x79   :  { %s92_s20 = sshll.u32 %s1105_s19, 4  ;;  %s114_s28 = sshll.u32 %s1106_s27, 4  ;;  %s93_s20 = int_to_ptr.vmem [resolvable:$true] %s92_s20  ;;  %s115_s28 = int_to_ptr.vmem [resolvable:$true] %s114_s28 }
  0x7a   :  { %s1018_s13 = scalar_lea.hbm %s1339_s6, 16 }
  0x7b   :  { %p1019_p0 = scmp.ne.s32.totalorder %s1339_s6, %s1018_s13  ;;  %p1022_p1 = scmp.lt.u32.totalorder %s1018_s13, %s1339_s6 }
  0x7d   :  { %p1024_p2 = pnand %p1022_p1, %p1019_p0 }
  0x7f   :  { %1027 = shalt.err (!%p1024_p2)
}
  0x80   :  { %s1028_s4 = scalar_lea.vmem %s93_s20, 16  ;;  %s1032_s29 = scalar_lea.vmem %s93_s20, 32 }
  0x81   :  { %p1029_p3 = scmp.ne.s32.totalorder %s93_s20, %s1028_s4  ;;  %p1033_p4 = scmp.lt.s32.totalorder %s93_s20, %s93_s20 }
  0x82   :  { %p1034_p5 = scmp.lt.s32.totalorder %s1032_s29, %s1028_s4 }
  0x84   :  { %p1035_p6 = por %p1034_p5, %p1033_p4 }
  0x86   :  { %p1036_p7 = pnand %p1035_p6, %p1029_p3 }
  0x88   :  { %1039 = shalt.err (!%p1036_p7)
}
  0x89   :  { %95 = dma.hbm_to_vmem [thread:$0]  %s1339_s6, 16, %s93_s20, [#allocation12]  }
  0x8a   :  { %s1040_s16 = scalar_lea.hbm %s1341_s8, 16 }
  0x8b   :  { %p1041_p8 = scmp.ne.s32.totalorder %s1341_s8, %s1040_s16  ;;  %p1044_p9 = scmp.lt.u32.totalorder %s1040_s16, %s1341_s8 }
  0x8d   :  { %p1046_p10 = pnand %p1044_p9, %p1041_p8 }
  0x8f   :  { %1049 = shalt.err (!%p1046_p10)
}
  0x90   :  { %s1050_s23 = scalar_lea.vmem %s115_s28, 16  ;;  %s1054_s25 = scalar_lea.vmem %s115_s28, 32 }
  0x91   :  { %p1051_p11 = scmp.ne.s32.totalorder %s115_s28, %s1050_s23  ;;  %p1055_p12 = scmp.lt.s32.totalorder %s115_s28, %s115_s28 }
  0x92   :  { %p1056_p13 = scmp.lt.s32.totalorder %s1054_s25, %s1050_s23 }
  0x94   :  { %p1057_p0 = por %p1056_p13, %p1055_p12 }
  0x96   :  { %p1058_p1 = pnand %p1057_p0, %p1051_p11 }
  0x98   :  { %1061 = shalt.err (!%p1058_p1)
}
  0x99   :  { %117 = dma.hbm_to_vmem [thread:$0]  %s1341_s8, 16, %s115_s28, [#allocation15]  }
  0x9a   :  { %1084 = dma.done.wait [#allocation3], 128  }
  0x9b   :  { %1085 = vsyncadd [#allocation3], 4294967168 }
  0x9c   :  { %1086 = dma.done.wait [#allocation6], 2064  }
  0x9d   :  { %1087 = vsyncadd [#allocation6], 4294965232 }
  0x9e   :  { %1088 = dma.done.wait [#allocation9], 2064  }
  0x9f   :  { %1089 = vsyncadd [#allocation9], 4294965232 }
  0xa0   :  { %1090 = dma.done.wait [#allocation12], 2064  }
  0xa1   :  { %1091 = vsyncadd [#allocation12], 4294965232 }
  0xa2   :  { %1092 = dma.done.wait [#allocation15], 2064  }
  0xa3   :  { %1093 = vsyncadd [#allocation15], 4294965232  ;;  %v1107_v0 = vmov 0.0|0.0   ;;  %vm1108_vm0 = vmmov 0   ;;  %v1109_v1 = vmov 0.0   ;;  %v146_v2 = vld [vmem:[#allocation5] sm:$0xff] }
  0xa4   :  { %753 = vmatprep.subr.bf16.mxu0 %v1107_v0  ;;  %645 = vmatprep.mubr.msk.f32.mxu0 %vm1108_vm0, %v1109_v1  ;;  %v147_v3 = vld [vmem:[#allocation5 + $0x8] sm:$0xff]  ;;  %v148_v4 = vld [vmem:[#allocation5 + $0x10] sm:$0xff]  ;;  %v149_v6 = vld [vmem:[#allocation5 + $0x18] sm:$0xff]  ;;  %s1110_s8 = smov [#allocation17]  }
  0xa5   :  { %777 = vmatprep.subr.bf16.mxu1 %v1107_v0  ;;  %680 = vmatprep.mubr.msk.f32.mxu1 %vm1108_vm0, %v1109_v1  ;;  %v754_v5 = vpack.c.bf16 %v147_v3, %v146_v2  ;;  %v757_v7 = vpack.c.bf16 %v149_v6, %v148_v4  ;;  %v150_v8 = vld [vmem:[#allocation5 + $0x20] sm:$0xff]  ;;  %v151_v9 = vld [vmem:[#allocation5 + $0x28] sm:$0xff]  ;;  %v242_v12 = vld [vmem:[#allocation8 + $0x10] sm:$0xff]  ;;  %s528_s24 = sshll.u32 %s1110_s8, 4  ;;  %s529_s24 = int_to_ptr.vmem [resolvable:$true] %s528_s24 }
  0xa6   :  { %v240_v10 = vld [vmem:[#allocation8] sm:$0xff]  ;;  %v241_v11 = vld [vmem:[#allocation8 + $0x8] sm:$0xff]  ;;  %v243_v13 = vld [vmem:[#allocation8 + $0x18] sm:$0xff]  ;;  %v760_v14 = vpack.c.bf16 %v151_v9, %v150_v8  ;;  %s1062_s2 = scalar_lea.vmem %s529_s24, 128  ;;  %p1067_p3 = scmp.lt.s32.totalorder %s529_s24, %s529_s24 }
  0xa7   :  { %755 = vmatpush3.bf16.msra.mxu0 %v754_v5  ;;  %v778_v15 = vpack.c.bf16 %v241_v11, %v240_v10  ;;  %v152_v16 = vld [vmem:[#allocation5 + $0x30] sm:$0xff]  ;;  %v153_v17 = vld [vmem:[#allocation5 + $0x38] sm:$0xff]  ;;  %v781_v18 = vpack.c.bf16 %v243_v13, %v242_v12  ;;  %v244_v19 = vld [vmem:[#allocation8 + $0x20] sm:$0xff]  ;;  %p1063_p2 = scmp.ne.s32.totalorder %s529_s24, %s1062_s2  ;;  %p1068_p4 = scmp.lt.s32.totalorder %s1062_s2, %s1062_s2 }
  0xa8   :  { %756 = vmatprep.subr.bf16.mxu0 %v1107_v0  ;;  %v245_v20 = vld [vmem:[#allocation8 + $0x28] sm:$0xff]  ;;  %v763_v21 = vpack.c.bf16 %v153_v17, %v152_v16  ;;  %v154_v22 = vld [vmem:[#allocation5 + $0x40] sm:$0xff]  ;;  %v246_v25 = vld [vmem:[#allocation8 + $0x30] sm:$0xff] }
  0xa9   :  { %779 = vmatpush3.bf16.msra.mxu1 %v778_v15  ;;  %v155_v23 = vld [vmem:[#allocation5 + $0x48] sm:$0xff]  ;;  %v784_v24 = vpack.c.bf16 %v245_v20, %v244_v19  ;;  %v247_v26 = vld [vmem:[#allocation8 + $0x38] sm:$0xff]  ;;  %v156_v28 = vld [vmem:[#allocation5 + $0x50] sm:$0xff]  ;;  %p1069_p5 = por %p1068_p4, %p1067_p3 }
  0xaa   :  { %780 = vmatprep.subr.bf16.mxu1 %v1107_v0  ;;  %v766_v27 = vpack.c.bf16 %v155_v23, %v154_v22  ;;  %v157_v29 = vld [vmem:[#allocation5 + $0x58] sm:$0xff]  ;;  %v787_v30 = vpack.c.bf16 %v247_v26, %v246_v25  ;;  %v248_v31 = vld [vmem:[#allocation8 + $0x40] sm:$0xff]  ;;  %v249_v32 = vld [vmem:[#allocation8 + $0x48] sm:$0xff] }
  0xab   :  { %758 = vmatpush3.bf16.msra.mxu0 %v757_v7  ;;  %v769_v33 = vpack.c.bf16 %v157_v29, %v156_v28  ;;  %v158_v34 = vld [vmem:[#allocation5 + $0x60] sm:$0xff]  ;;  %v159_v35 = vld [vmem:[#allocation5 + $0x68] sm:$0xff]  ;;  %v790_v36 = vpack.c.bf16 %v249_v32, %v248_v31  ;;  %v250_v37 = vld [vmem:[#allocation8 + $0x50] sm:$0xff]  ;;  %p1070_p6 = pnand %p1069_p5, %p1063_p2 }
  0xac   :  { %759 = vmatprep.subr.bf16.mxu0 %v1107_v0  ;;  %v251_v38 = vld [vmem:[#allocation8 + $0x58] sm:$0xff]  ;;  %v772_v39 = vpack.c.bf16 %v159_v35, %v158_v34  ;;  %v160_v40 = vld [vmem:[#allocation5 + $0x70] sm:$0xff]  ;;  %v252_v43 = vld [vmem:[#allocation8 + $0x60] sm:$0xff] }
  0xad   :  { %782 = vmatpush3.bf16.msra.mxu1 %v781_v18  ;;  %v161_v41 = vld [vmem:[#allocation5 + $0x78] sm:$0xff]  ;;  %v793_v42 = vpack.c.bf16 %v251_v38, %v250_v37  ;;  %v253_v44 = vld [vmem:[#allocation8 + $0x68] sm:$0xff]  ;;  %v541_v10 = vld [vmem:[#allocation7] ss:$0 sm:$0xff] }
  0xae   :  { %783 = vmatprep.subr.bf16.mxu1 %v1107_v0  ;;  %v775_v45 = vpack.c.bf16 %v161_v41, %v160_v40  ;;  %v796_v46 = vpack.c.bf16 %v253_v44, %v252_v43  ;;  %v145_v47 = vld [vmem:[#allocation2] sm:$0xff]  ;;  %v334_v51 = vld [vmem:[#allocation11] sm:$0xff]  ;;  %v335_v52 = vld [vmem:[#allocation11 + $0x8] sm:$0xff] }
  0xaf   :  { %761 = vmatpush3.bf16.msra.mxu0 %v760_v14  ;;  %v254_v48 = vld [vmem:[#allocation8 + $0x70] sm:$0xff]  ;;  %v255_v49 = vld [vmem:[#allocation8 + $0x78] sm:$0xff]  ;;  %v802_v54 = vpack.c.bf16 %v335_v52, %v334_v51  ;;  %v338_v57 = vld [vmem:[#allocation11 + $0x20] sm:$0xff] }
  0xb0   :  { %762 = vmatprep.subr.bf16.mxu0 %v1107_v0  ;;  %v799_v50 = vpack.c.bf16 %v255_v49, %v254_v48  ;;  %v336_v53 = vld [vmem:[#allocation11 + $0x10] sm:$0xff]  ;;  %v337_v55 = vld [vmem:[#allocation11 + $0x18] sm:$0xff]  ;;  %v339_v58 = vld [vmem:[#allocation11 + $0x28] sm:$0xff] }
  0xb1   :  { %785 = vmatpush3.bf16.msra.mxu1 %v784_v24  ;;  %v805_v56 = vpack.c.bf16 %v337_v55, %v336_v53  ;;  %v808_v59 = vpack.c.bf16 %v339_v58, %v338_v57  ;;  %v340_v60 = vld [vmem:[#allocation11 + $0x30] sm:$0xff]  ;;  %v341_v61 = vld [vmem:[#allocation11 + $0x38] sm:$0xff]  ;;  %v342_v63 = vld [vmem:[#allocation11 + $0x40] sm:$0xff] }
  0xb2   :  { %786 = vmatprep.subr.bf16.mxu1 %v1107_v0  ;;  %v811_v62 = vpack.c.bf16 %v341_v61, %v340_v60  ;;  %v343_v2 = vld [vmem:[#allocation11 + $0x48] sm:$0xff]  ;;  %v344_v4 = vld [vmem:[#allocation11 + $0x50] sm:$0xff]  ;;  %v345_v5 = vld [vmem:[#allocation11 + $0x58] sm:$0xff] }
  0xb3   :  { %764 = vmatpush3.bf16.msra.mxu0 %v763_v21  ;;  %v814_v3 = vpack.c.bf16 %v343_v2, %v342_v63  ;;  %v817_v6 = vpack.c.bf16 %v345_v5, %v344_v4  ;;  %v346_v7 = vld [vmem:[#allocation11 + $0x60] sm:$0xff]  ;;  %v347_v8 = vld [vmem:[#allocation11 + $0x68] sm:$0xff]  ;;  %v348_v15 = vld [vmem:[#allocation11 + $0x70] sm:$0xff] }
  0xb4   :  { %765 = vmatprep.subr.bf16.mxu0 %v1107_v0  ;;  %v820_v9 = vpack.c.bf16 %v347_v8, %v346_v7  ;;  %v349_v16 = vld [vmem:[#allocation11 + $0x78] sm:$0xff]  ;;  %v428_v18 = vld [vmem:[#allocation14] sm:$0xff]  ;;  %v429_v19 = vld [vmem:[#allocation14 + $0x8] sm:$0xff] }
  0xb5   :  { %788 = vmatpush3.bf16.msra.mxu1 %v787_v30  ;;  %v823_v17 = vpack.c.bf16 %v349_v16, %v348_v15  ;;  %v430_v20 = vld [vmem:[#allocation14 + $0x10] sm:$0xff]  ;;  %v826_v21 = vpack.c.bf16 %v429_v19, %v428_v18  ;;  %v431_v22 = vld [vmem:[#allocation14 + $0x18] sm:$0xff]  ;;  %v432_v24 = vld [vmem:[#allocation14 + $0x20] sm:$0xff] }
  0xb6   :  { %789 = vmatprep.subr.bf16.mxu1 %v1107_v0  ;;  %v829_v23 = vpack.c.bf16 %v431_v22, %v430_v20  ;;  %v433_v25 = vld [vmem:[#allocation14 + $0x28] sm:$0xff]  ;;  %v436_v29 = vld [vmem:[#allocation14 + $0x40] sm:$0xff]  ;;  %v438_v32 = vld [vmem:[#allocation14 + $0x50] sm:$0xff] }
  0xb7   :  { %767 = vmatpush3.bf16.msra.mxu0 %v766_v27  ;;  %v832_v26 = vpack.c.bf16 %v433_v25, %v432_v24  ;;  %v435_v27 = vld [vmem:[#allocation14 + $0x38] sm:$0xff]  ;;  %v437_v30 = vld [vmem:[#allocation14 + $0x48] sm:$0xff]  ;;  %v440_v35 = vld [vmem:[#allocation14 + $0x60] sm:$0xff] }
  0xb8   :  { %768 = vmatprep.subr.bf16.mxu0 %v1107_v0  ;;  %v838_v31 = vpack.c.bf16 %v437_v30, %v436_v29  ;;  %v542_v38 = vld [vmem:[#allocation10] ss:$0 sm:$0xff]  ;;  %v442_v43 = vld [vmem:[#allocation14 + $0x70] sm:$0xff]  ;;  %v544_v51 = vld [vmem:[#allocation16] ss:$0 sm:$0xff] }
  0xb9   :  { %791 = vmatpush3.bf16.msra.mxu1 %v790_v36  ;;  %v441_v36 = vld [vmem:[#allocation14 + $0x68] sm:$0xff]  ;;  %v443_v44 = vld [vmem:[#allocation14 + $0x78] sm:$0xff] }
  0xba   :  { %792 = vmatprep.subr.bf16.mxu1 %v1107_v0  ;;  %v844_v37 = vpack.c.bf16 %v441_v36, %v440_v35 }
  0xbb   :  { %770 = vmatpush3.bf16.msra.mxu0 %v769_v33  ;;  %v439_v33 = vld [vmem:[#allocation14 + $0x58] sm:$0xff] }
  0xbc   :  { %771 = vmatprep.subr.bf16.mxu0 %v1107_v0  ;;  %v841_v34 = vpack.c.bf16 %v439_v33, %v438_v32 }
  0xbd   :  { %794 = vmatpush3.bf16.msra.mxu1 %v793_v42 }
  0xbe   :  { %795 = vmatprep.subr.bf16.mxu1 %v1107_v0 }
  0xbf   :  { %773 = vmatpush3.bf16.msra.mxu0 %v772_v39 }
  0xc0   :  { %774 = vmatprep.subr.bf16.mxu0 %v1107_v0 }
  0xc1   :  { %797 = vmatpush3.bf16.msra.mxu1 %v796_v46  ;;  %v543_v46 = vld [vmem:[#allocation13] ss:$0 sm:$0xff] }
  0xc2   :  { %798 = vmatprep.subr.bf16.mxu1 %v1107_v0 }
  0xc3   :  { %776 = vmatpush3.bf16.msra.mxu0 %v775_v45  ;;  %v847_v45 = vpack.c.bf16 %v443_v44, %v442_v43 }
  0xc4   :  { %801 = vmatprep.subr.bf16.mxu0 %v1107_v0 }
  0xc5   :  { %800 = vmatpush3.bf16.msra.mxu1 %v799_v50 }
  0xc6   :  { %646 = vmatmul.mubr.f32.vlgmr.msra.gmra.mrb[0].mxu0 %v145_v47  ;;  %825 = vmatprep.subr.bf16.mxu1 %v1107_v0 }
  0xc7   :  { %715 = vmatprep.mubr.msk.f32.mxu0 %vm1108_vm0, %v1109_v1  ;;  %803 = vmatpush3.bf16.msra.mxu0 %v802_v54 }
  0xc8   :  { %804 = vmatprep.subr.bf16.mxu0 %v1107_v0 }
  0xcb   :  { %806 = vmatpush3.bf16.msra.mxu0 %v805_v56 }
  0xcc   :  { %807 = vmatprep.subr.bf16.mxu0 %v1107_v0 }
  0xcf   :  { %809 = vmatpush3.bf16.msra.mxu0 %v808_v59 }
  0xd0   :  { %810 = vmatprep.subr.bf16.mxu0 %v1107_v0 }
  0xd3   :  { %812 = vmatpush3.bf16.msra.mxu0 %v811_v62 }
  0xd4   :  { %813 = vmatprep.subr.bf16.mxu0 %v1107_v0 }
  0xd7   :  { %815 = vmatpush3.bf16.msra.mxu0 %v814_v3 }
  0xd8   :  { %816 = vmatprep.subr.bf16.mxu0 %v1107_v0 }
  0xdb   :  { %818 = vmatpush3.bf16.msra.mxu0 %v817_v6 }
  0xdc   :  { %819 = vmatprep.subr.bf16.mxu0 %v1107_v0 }
  0xdf   :  { %821 = vmatpush3.bf16.msra.mxu0 %v820_v9 }
  0xe0   :  { %822 = vmatprep.subr.bf16.mxu0 %v1107_v0 }
  0xe3   :  { %824 = vmatpush3.bf16.msra.mxu0 %v823_v17 }
 0x199   :  { %v235_v11 = vpop.f32.mrb[0].mxu0 }
 0x19a   :  { %v236_v12 = vadd.f32 %v541_v10, %v235_v11  ;;  %v647_v13 = vpop.f32.mrb[1].mxu0 }
 0x19c   :  { %v239_v14 = vmax.f32 %v236_v12, 0.0 }
 0x19e   :  { %681 = vmatmul.mubr.f32.vlgmr.msra.gmra.mrb[0].mxu1 %v239_v14 }
 0x19f   :  { %750 = vmatprep.mubr.msk.f32.mxu1 %vm1108_vm0, %v1109_v1  ;;  %827 = vmatpush3.bf16.msra.mxu1 %v826_v21  ;;  %v434_v1 = vld [vmem:[#allocation14 + $0x30] sm:$0xff] }
 0x1a0   :  { %828 = vmatprep.subr.bf16.mxu1 %v1107_v0  ;;  %v835_v28 = vpack.c.bf16 %v435_v27, %v434_v1 }
 0x1a3   :  { %830 = vmatpush3.bf16.msra.mxu1 %v829_v23 }
 0x1a4   :  { %831 = vmatprep.subr.bf16.mxu1 %v1107_v0 }
 0x1a7   :  { %833 = vmatpush3.bf16.msra.mxu1 %v832_v26 }
 0x1a8   :  { %834 = vmatprep.subr.bf16.mxu1 %v1107_v0 }
 0x1ab   :  { %836 = vmatpush3.bf16.msra.mxu1 %v835_v28 }
 0x1ac   :  { %837 = vmatprep.subr.bf16.mxu1 %v1107_v0 }
 0x1af   :  { %839 = vmatpush3.bf16.msra.mxu1 %v838_v31 }
 0x1b0   :  { %840 = vmatprep.subr.bf16.mxu1 %v1107_v0 }
 0x1b3   :  { %842 = vmatpush3.bf16.msra.mxu1 %v841_v34 }
 0x1b4   :  { %843 = vmatprep.subr.bf16.mxu1 %v1107_v0 }
 0x1b7   :  { %845 = vmatpush3.bf16.msra.mxu1 %v844_v37 }
 0x1b8   :  { %846 = vmatprep.subr.bf16.mxu1 %v1107_v0 }
 0x1bb   :  { %848 = vmatpush3.bf16.msra.mxu1 %v847_v45 }
 0x271   :  { %v329_v39 = vpop.f32.mrb[0].mxu1 }
 0x272   :  { %v330_v40 = vadd.f32 %v542_v38, %v329_v39  ;;  %v682_v41 = vpop.f32.mrb[1].mxu1 }
 0x274   :  { %v333_v42 = vmax.f32 %v330_v40, 0.0 }
 0x276   :  { %716 = vmatmul.mubr.f32.vlgmr.msra.gmra.mrb[2].mxu0 %v333_v42 }
 0x349   :  { %v423_v47 = vpop.f32.mrb[2].mxu0 }
 0x34a   :  { %v424_v48 = vadd.f32 %v543_v46, %v423_v47  ;;  %v717_v49 = vpop.f32.mrb[3].mxu0 }
 0x34c   :  { %v427_v50 = vmax.f32 %v424_v48, 0.0 }
 0x34e   :  { %751 = vmatmul.mubr.f32.vlgmr.msra.gmra.mrb[2].mxu1 %v427_v50 }
 0x421   :  { %v517_v0 = vpop.f32.mrb[2].mxu1 }
 0x422   :  { %v518_v52 = vadd.f32 %v544_v51, %v517_v0  ;;  %v752_v53 = vpop.f32.mrb[3].mxu1 }
 0x424   :  { %521 = vst [vmem:[#allocation17] sm:$0xff] %v518_v52 }
 0x425   :  { %1073 = shalt.err (!%p1070_p6)
}
 0x426   :  { %s1074_s20 = scalar_lea.hbm %s1342_s9, 128 }
 0x427   :  { %p1075_p7 = scmp.ne.s32.totalorder %s1342_s9, %s1074_s20  ;;  %p1078_p8 = scmp.lt.u32.totalorder %s1074_s20, %s1342_s9 }
 0x429   :  { %p1080_p9 = pnand %p1078_p8, %p1075_p7 }
 0x42b   :  { %1083 = shalt.err (!%p1080_p9)
}
 0x42c   :  { %531 = dma.vmem_to_hbm [thread:$0]  %s529_s24, 128, %s1342_s9, [#allocation4]  }
 0x42d   :  { %1094 = dma.done.wait [#allocation4], 128  }
 0x42e   :  { %1095 = vsyncadd [#allocation4], 4294967168 }
 0x42f   :  { %535 = vsyncpa [#allocation3], 1 }
 0x430   :  { %536 = vsyncpa [#allocation6], 1 }
 0x431   :  { %537 = vsyncpa [#allocation9], 1 }
 0x432   :  { %538 = vsyncpa [#allocation12], 1 }
 0x433   :  { %539 = vsyncpa [#allocation15], 1 }
 0x434   :  { %540 = vsyncpa [#allocation4], 1 }

</bundles_post_ra>
